<compile_context>
chip_gen: v6e
topology: v6e:2x2x1
jax: 0.10.0
libtpu: 0.0.40
codegen_flags: <defaults>
</compile_context>

<pallas_src>
import functools

import jax
import jax.numpy as jnp
from jax.experimental import pallas as pl
from jax.experimental.pallas import tpu as pltpu


# ----------------------------------------------------------------------------
# Kernels
# ----------------------------------------------------------------------------
def _tood_kernel_native(feat_ref, w1_ref, b1_ref, w2e_ref, b2e_ref,
                        wred_ref, bnb_ref, out_ref, *, inv_hw):
    """One image per grid step; feat block is (in_c, HW) in native layout."""
    x = feat_ref[...].astype(jnp.float32)                           # (in_c, HW)

    # adaptive_avg_pool2d(feat, (1,1)): global spatial mean (XLU row reduce).
    avg = jnp.sum(x, axis=-1, keepdims=True) * inv_hw               # (in_c, 1)

    # layer attention: 1x1 conv -> ReLU -> (row-expanded) 1x1 conv -> sigmoid.
    h = jnp.maximum(
        jnp.dot(w1_ref[...], avg, preferred_element_type=jnp.float32)
        + b1_ref[...], 0.0)                                          # (hid, 1)
    attn = jax.nn.sigmoid(
        jnp.dot(w2e_ref[...], h, preferred_element_type=jnp.float32)
        + b2e_ref[...])                                              # (in_c, 1)

    # bmm(attention-scaled weight, feat) == wred @ (attn * feat).  BN scale is
    # pre-folded into wred on the host, so the epilogue is bias + ReLU only.
    scaled = (x * attn).astype(wred_ref.dtype)                       # (in_c, HW)
    out = jnp.dot(wred_ref[...], scaled,
                  preferred_element_type=jnp.float32)                # (fc, HW)
    out_ref[...] = jnp.maximum(out + bnb_ref[...], 0.0).astype(out_ref.dtype)


def _tood_kernel_slab(feat_ref, pool_ref, bcast_ref, w1_ref, b1_ref,
                      w2e_ref, b2e_ref, wred_ref, bnb_ref, out_ref):
    """BT images per grid step; feat block is a lane-dense (in_c, BT*HW) slab."""
    x = feat_ref[...].astype(jnp.float32)                            # (in_c, L)

    # Segmented spatial mean per image via a constant pooling matrix (L, BT).
    avg = jnp.dot(x, pool_ref[...],
                  preferred_element_type=jnp.float32)                # (in_c, BT)

    h = jnp.maximum(
        jnp.dot(w1_ref[...], avg, preferred_element_type=jnp.float32)
        + b1_ref[...], 0.0)                                          # (hid, BT)
    attn = jax.nn.sigmoid(
        jnp.dot(w2e_ref[...], h, preferred_element_type=jnp.float32)
        + b2e_ref[...])                                              # (in_c, BT)

    # Broadcast each image's per-channel attention across its HW columns with
    # a constant 0/1 matrix (BT, L).
    attn_map = jnp.dot(attn, bcast_ref[...],
                       preferred_element_type=jnp.float32)           # (in_c, L)

    scaled = (x * attn_map).astype(wred_ref.dtype)                   # (in_c, L)
    out = jnp.dot(wred_ref[...], scaled,
                  preferred_element_type=jnp.float32)                # (fc, L)
    out_ref[...] = jnp.maximum(out + bnb_ref[...], 0.0).astype(out_ref.dtype)


# ----------------------------------------------------------------------------
# Host wrapper
# ----------------------------------------------------------------------------
def _choose_bt(B, HW, itemsize, in_c, fc, target_lanes=1024,
               vmem_budget=24 * 1024 * 1024):
    """Images per step for the HW<128 slab path.

    BT always divides B (no batch-pad copy); BT*HW must be a multiple of 128
    (unmasked lane-dense stores) unless BT == B (block == full array, always
    legal).  Sized against v7x's 32 MiB scoped-VMEM default with headroom, and
    prefers >= 2 grid steps so both v7x TensorCores get work.
    """
    def fits(d):
        L = d * HW
        # double-buffered feat + out blocks, plus pool/bcast constants
        return (2 * (in_c + fc) * L * itemsize + 2 * d * L * 4) <= vmem_budget

    divisors = [d for d in range(1, B + 1) if B % d == 0 and fits(d)]
    if not divisors:
        return B  # fallback: single full-array block
    lane_ok = [d for d in divisors if (d * HW) % 128 == 0]
    if not lane_ok:
        return B  # only a full-array block satisfies the (8,128) rule
    big = [d for d in lane_ok if d * HW >= target_lanes and B // d >= 2]
    if big:
        return min(big)            # hits lane target, keeps >= 2 steps (v7x)
    big = [d for d in lane_ok if d * HW >= target_lanes]
    if big:
        return min(big)            # hits lane target (v5e/v6e: one big block ok)
    two_step = [d for d in lane_ok if B // d >= 2]
    if two_step:
        return max(two_step)       # widest lane-aligned block with >= 2 steps
    return max(lane_ok)


def task_decomposition(feat_flat, w1, b1, w2_exp, b2_exp, w_red,
                       bn_scale, bn_bias, *, io_dtype=jnp.bfloat16,
                       out_dtype=None, target_lanes=1024):
    """TOOD TaskDecomposition forward.

    feat_flat: (B, in_channels, H*W).  Returns (B, feat_channels, H*W).
    io_dtype controls activation I/O and main-matmul operand dtype (bf16 by
    default, f32 accumulation always); out_dtype defaults to io_dtype.
    """
    B, in_c, HW = feat_flat.shape
    hid = w1.shape[0]
    fc = w_red.shape[0]
    out_dtype = io_dtype if out_dtype is None else out_dtype

    # Fold eval-mode BN scale into the reduction-conv weight (exact algebra),
    # then cast operands once on the host (before any bf16 quantization).
    w_red_f = (w_red * bn_scale.reshape(fc, 1)).astype(io_dtype)
    bnb = bn_bias.reshape(fc, 1).astype(jnp.float32)
    w1f = w1.astype(jnp.float32)
    b1c = b1.reshape(hid, 1).astype(jnp.float32)
    w2f = w2_exp.astype(jnp.float32)
    b2c = b2_exp.reshape(in_c, 1).astype(jnp.float32)

    # Small constant weights: full-block, constant index (tiny DMAs).
    wspecs = [
        pl.BlockSpec((hid, in_c), lambda *_: (0, 0)),   # layer-attn conv1 W
        pl.BlockSpec((hid, 1), lambda *_: (0, 0)),      # layer-attn conv1 b
        pl.BlockSpec((in_c, hid), lambda *_: (0, 0)),   # conv2 W (row-expanded)
        pl.BlockSpec((in_c, 1), lambda *_: (0, 0)),     # conv2 b (row-expanded)
        pl.BlockSpec((fc, in_c), lambda *_: (0, 0)),    # reduction W (BN-folded)
        pl.BlockSpec((fc, 1), lambda *_: (0, 0)),       # folded BN bias
    ]

    if HW >= 128:
        # ------------------------------------------------------------------
        # Native-layout path: no host transpose/reshape copies at all.
        # Grid over batch -> B parallel steps (keeps both v7x TCs busy).
        # ------------------------------------------------------------------
        feat_io = feat_flat.astype(io_dtype)
        out = pl.pallas_call(
            functools.partial(_tood_kernel_native, inv_hw=1.0 / HW),
            out_shape=jax.ShapeDtypeStruct((B, fc, HW), out_dtype),
            grid_spec=pltpu.PrefetchScalarGridSpec(
                num_scalar_prefetch=0,
                grid=(B,),
                in_specs=[pl.BlockSpec((pl.Squeezed(), in_c, HW),
                                       lambda b: (b, 0, 0))] + wspecs,
                out_specs=pl.BlockSpec((pl.Squeezed(), fc, HW),
                                       lambda b: (b, 0, 0)),
            ),
            compiler_params=pltpu.CompilerParams(
                dimension_semantics=("parallel",)),
        )(feat_io, w1f, b1c, w2f, b2c, w_red_f, bnb)
        return out

    # ----------------------------------------------------------------------
    # Slab path (HW < 128): lane-dense (in_c, B*HW) layout, BT images / step.
    # ----------------------------------------------------------------------
    BT = _choose_bt(B, HW, jnp.dtype(io_dtype).itemsize, in_c, fc, target_lanes)
    L = BT * HW
    feat2d = (jnp.transpose(feat_flat, (1, 0, 2))
              .reshape(in_c, B * HW).astype(io_dtype))

    # Constant segment-pooling / broadcast matrices for one BT-image block.
    seg = jnp.arange(L) // HW                                          # (L,)
    pool = (seg[:, None] == jnp.arange(BT)[None, :]).astype(jnp.float32) / HW
    bcast = (jnp.arange(BT)[:, None] == seg[None, :]).astype(jnp.float32)

    out2d = pl.pallas_call(
        _tood_kernel_slab,
        out_shape=jax.ShapeDtypeStruct((fc, B * HW), out_dtype),
        grid_spec=pltpu.PrefetchScalarGridSpec(
            num_scalar_prefetch=0,
            grid=(B // BT,),
            in_specs=[pl.BlockSpec((in_c, L), lambda g: (0, g)),
                      pl.BlockSpec((L, BT), lambda g: (0, 0)),
                      pl.BlockSpec((BT, L), lambda g: (0, 0))] + wspecs,
            out_specs=pl.BlockSpec((fc, L), lambda g: (0, g)),
        ),
        compiler_params=pltpu.CompilerParams(
            dimension_semantics=("parallel",)),
    )(feat2d, pool, bcast, w1f, b1c, w2f, b2c, w_red_f, bnb)

    return out2d.reshape(fc, B, HW).transpose(1, 0, 2)       # (B, fc, HW)


# ----------------------------------------------------------------------------
# Pure-JAX reference (transcription of the PyTorch forward, eval-mode BN)
# ----------------------------------------------------------------------------
def reference(feat_nchw, w1, b1, w2, b2, w_red, bn_scale, bn_bias,
              feat_channels, stacked_convs):
    b, c, h, w = feat_nchw.shape
    in_c = feat_channels * stacked_convs
    avg = feat_nchw.mean(axis=(2, 3))                                  # (b, in_c)
    hdd = jnp.maximum(avg @ w1.T + b1, 0.0)                            # (b, hid)
    wgt = jax.nn.sigmoid(hdd @ w2.T + b2)                              # (b, S)
    conv_weight = (wgt[:, None, :, None] *
                   w_red.reshape(1, feat_channels, stacked_convs, feat_channels))
    conv_weight = conv_weight.reshape(b, feat_channels, in_c)
    f = feat_nchw.reshape(b, in_c, h * w)
    out = jnp.einsum('bij,bjk->bik', conv_weight, f)
    out = out * bn_scale[None, :, None] + bn_bias[None, :, None]
    return jnp.maximum(out, 0.0).reshape(b, feat_channels, h, w)


if __name__ == "__main__":
    feat_channels = 16
    stacked_convs = 6
    la_down_rate = 8
    in_channels = feat_channels * stacked_convs          # 96
    hidden = in_channels // la_down_rate                 # 12
    B = 4

    key = jax.random.PRNGKey(0)
    ks = jax.random.split(key, 12)

    # layer_attention conv1 / conv2 (1x1 convs on a 1x1 map == dense layers)
    w1 = jax.random.normal(ks[1], (hidden, in_channels), jnp.float32) * 0.001
    b1 = jax.random.normal(ks[2], (hidden,), jnp.float32) * 0.001
    w2 = jax.random.normal(ks[3], (stacked_convs, hidden), jnp.float32) * 0.001
    b2 = jax.random.normal(ks[4], (stacked_convs,), jnp.float32) * 0.001

    # reduction_conv: Conv2d(in_c, fc, 1, bias=False) + BN (eval) + ReLU
    w_red = jax.random.normal(ks[5], (feat_channels, in_channels), jnp.float32) * 0.01
    bn_gamma = 1.0 + 0.1 * jax.random.normal(ks[6], (feat_channels,), jnp.float32)
    bn_beta = 0.1 * jax.random.normal(ks[7], (feat_channels,), jnp.float32)
    bn_mean = 0.1 * jax.random.normal(ks[8], (feat_channels,), jnp.float32)
    bn_var = jnp.abs(jax.random.normal(ks[9], (feat_channels,), jnp.float32)) + 0.5
    eps = 1e-5
    bn_scale = bn_gamma / jnp.sqrt(bn_var + eps)
    bn_bias = bn_beta - bn_mean * bn_scale

    # Row-expand the layer-attention output layer so each of the in_channels
    # rows already carries its layer's attention (row s*fc + ic uses layer s).
    w2_exp = jnp.repeat(w2, feat_channels, axis=0)            # (in_c, hidden)
    b2_exp = jnp.repeat(b2, feat_channels, axis=0)            # (in_c,)

    # Exercise both layouts: native (HW >= 128) and slab (HW < 128).
    for (H, W), feat_key in (((16, 16), ks[0]), ((8, 8), ks[10])):
        feat = jax.random.normal(feat_key, (B, in_channels, H, W), jnp.float32)
        feat_flat = feat.reshape(B, in_channels, H * W)
        ref = reference(feat, w1, b1, w2, b2, w_red, bn_scale, bn_bias,
                        feat_channels, stacked_convs)
        args = (feat_flat, w1, b1, w2_exp, b2_exp, w_red, bn_scale, bn_bias)

        # Strict f32 path for a tight semantic check.
        out_f32 = jax.block_until_ready(
            task_decomposition(*args, io_dtype=jnp.float32,
                               out_dtype=jnp.float32)
        ).reshape(B, feat_channels, H, W)
        assert out_f32.shape == ref.shape
        assert jnp.allclose(out_f32, ref, atol=1e-4, rtol=1e-4), \
            f"f32 mismatch vs reference at HW={H * W}"

        # Performance path: bf16 activation I/O + bf16 MXU operands, f32 acc.
        out_bf16 = jax.block_until_ready(
            task_decomposition(*args, io_dtype=jnp.bfloat16)
        ).astype(jnp.float32).reshape(B, feat_channels, H, W)
        assert jnp.allclose(out_bf16, ref, atol=2e-2, rtol=5e-2), \
            f"bf16 mismatch vs reference at HW={H * W}"

    print("KERNEL_OK")
</pallas_src>

<mosaic_0001>
module attributes {stable_mosaic.version = 11 : i64} {
  func.func @_tood_kernel_native(%arg0: i32, %arg1: memref<1x96x256xf32, #tpu.memory_space<vmem>>, %arg2: memref<12x96xf32, #tpu.memory_space<vmem>>, %arg3: memref<12x1xf32, #tpu.memory_space<vmem>>, %arg4: memref<96x12xf32, #tpu.memory_space<vmem>>, %arg5: memref<96x1xf32, #tpu.memory_space<vmem>>, %arg6: memref<16x96xf32, #tpu.memory_space<vmem>>, %arg7: memref<16x1xf32, #tpu.memory_space<vmem>>, %arg8: memref<1x16x256xf32, #tpu.memory_space<vmem>>) attributes {dimension_semantics = [#tpu.dimension_semantics<parallel>], iteration_bounds = array<i64: 4>, scalar_prefetch = 0 : i64, scratch_operands = 0 : i64, tpu.core_type = #tpu.core_type<tc>, window_params = [{transform_indices = @transform_0, window_bounds = array<i64: 1, 96, 256>}, {pipeline_mode = #tpu.pipeline_mode<synchronous>, transform_indices = @transform_1, window_bounds = array<i64: 12, 96>}, {pipeline_mode = #tpu.pipeline_mode<synchronous>, transform_indices = @transform_2, window_bounds = array<i64: 12, 1>}, {pipeline_mode = #tpu.pipeline_mode<synchronous>, transform_indices = @transform_3, window_bounds = array<i64: 96, 12>}, {pipeline_mode = #tpu.pipeline_mode<synchronous>, transform_indices = @transform_4, window_bounds = array<i64: 96, 1>}, {pipeline_mode = #tpu.pipeline_mode<synchronous>, transform_indices = @transform_5, window_bounds = array<i64: 16, 96>}, {pipeline_mode = #tpu.pipeline_mode<synchronous>, transform_indices = @transform_6, window_bounds = array<i64: 16, 1>}, {transform_indices = @transform_7, window_bounds = array<i64: 1, 16, 256>}]} {
    %c0 = arith.constant 0 : index
    %c0_0 = arith.constant 0 : index
    %c0_1 = arith.constant 0 : index
    %0 = vector.load %arg1[%c0, %c0_0, %c0_1] : memref<1x96x256xf32, #tpu.memory_space<vmem>>, vector<1x96x256xf32>
    %1 = vector.shape_cast %0 : vector<1x96x256xf32> to vector<96x256xf32>
    %cst = arith.constant dense<0.000000e+00> : vector<96xf32>
    %2 = vector.multi_reduction <add>, %1, %cst [1] : vector<96x256xf32> to vector<96xf32>
    %3 = vector.shape_cast %2 : vector<96xf32> to vector<96x1xf32>
    %cst_2 = arith.constant 3.906250e-03 : f32
    %4 = vector.broadcast %cst_2 : f32 to vector<96x1xf32>
    %5 = arith.mulf %3, %4 : vector<96x1xf32>
    %c0_3 = arith.constant 0 : index
    %c0_4 = arith.constant 0 : index
    %6 = vector.load %arg2[%c0_3, %c0_4] : memref<12x96xf32, #tpu.memory_space<vmem>>, vector<12x96xf32>
    %cst_5 = arith.constant dense<0.000000e+00> : vector<12x1xf32>
    %7 = tpu.matmul %6, %5, %cst_5 {dimension_numbers = #tpu.dot_dimension_numbers<[1], [0], [0], [1], [0, 0, 1, 1], [], []>} : vector<12x96xf32>, vector<96x1xf32>, vector<12x1xf32> -> vector<12x1xf32>
    %c0_6 = arith.constant 0 : index
    %c0_7 = arith.constant 0 : index
    %8 = vector.load %arg3[%c0_6, %c0_7] : memref<12x1xf32, #tpu.memory_space<vmem>>, vector<12x1xf32>
    %9 = arith.addf %7, %8 : vector<12x1xf32>
    %cst_8 = arith.constant 0.000000e+00 : f32
    %10 = vector.broadcast %cst_8 : f32 to vector<12x1xf32>
    %11 = arith.maximumf %9, %10 : vector<12x1xf32>
    %c0_9 = arith.constant 0 : index
    %c0_10 = arith.constant 0 : index
    %12 = vector.load %arg4[%c0_9, %c0_10] : memref<96x12xf32, #tpu.memory_space<vmem>>, vector<96x12xf32>
    %cst_11 = arith.constant dense<0.000000e+00> : vector<96x1xf32>
    %13 = tpu.matmul %12, %11, %cst_11 {dimension_numbers = #tpu.dot_dimension_numbers<[1], [0], [0], [1], [0, 0, 1, 1], [], []>} : vector<96x12xf32>, vector<12x1xf32>, vector<96x1xf32> -> vector<96x1xf32>
    %c0_12 = arith.constant 0 : index
    %c0_13 = arith.constant 0 : index
    %14 = vector.load %arg5[%c0_12, %c0_13] : memref<96x1xf32, #tpu.memory_space<vmem>>, vector<96x1xf32>
    %15 = arith.addf %13, %14 : vector<96x1xf32>
    %16 = arith.negf %15 : vector<96x1xf32>
    %17 = math.exp %16 : vector<96x1xf32>
    %cst_14 = arith.constant 1.000000e+00 : f32
    %18 = vector.broadcast %cst_14 : f32 to vector<96x1xf32>
    %19 = arith.addf %18, %17 : vector<96x1xf32>
    %20 = arith.divf %18, %19 : vector<96x1xf32>
    %21 = vector.broadcast %20 : vector<96x1xf32> to vector<96x256xf32>
    %22 = arith.mulf %1, %21 : vector<96x256xf32>
    %c0_15 = arith.constant 0 : index
    %c0_16 = arith.constant 0 : index
    %23 = vector.load %arg6[%c0_15, %c0_16] : memref<16x96xf32, #tpu.memory_space<vmem>>, vector<16x96xf32>
    %cst_17 = arith.constant dense<0.000000e+00> : vector<16x256xf32>
    %24 = tpu.matmul %23, %22, %cst_17 {dimension_numbers = #tpu.dot_dimension_numbers<[1], [0], [0], [1], [0, 0, 1, 1], [], []>} : vector<16x96xf32>, vector<96x256xf32>, vector<16x256xf32> -> vector<16x256xf32>
    %c0_18 = arith.constant 0 : index
    %c0_19 = arith.constant 0 : index
    %25 = vector.load %arg7[%c0_18, %c0_19] : memref<16x1xf32, #tpu.memory_space<vmem>>, vector<16x1xf32>
    %26 = vector.broadcast %25 : vector<16x1xf32> to vector<16x256xf32>
    %27 = arith.addf %24, %26 : vector<16x256xf32>
    %cst_20 = arith.constant 0.000000e+00 : f32
    %28 = vector.broadcast %cst_20 : f32 to vector<16x256xf32>
    %29 = arith.maximumf %27, %28 : vector<16x256xf32>
    %c0_21 = arith.constant 0 : index
    %c0_22 = arith.constant 0 : index
    %c0_23 = arith.constant 0 : index
    %30 = vector.load %arg8[%c0_21, %c0_22, %c0_23] : memref<1x16x256xf32, #tpu.memory_space<vmem>>, vector<1x16x256xf32>
    %31 = vector.shape_cast %30 : vector<1x16x256xf32> to vector<16x256xf32>
    %32 = vector.shape_cast %29 : vector<16x256xf32> to vector<1x16x256xf32>
    tpu.vector_store %arg8[%c0_21, %c0_22, %c0_23], %32 {strides = array<i32>} : memref<1x16x256xf32, #tpu.memory_space<vmem>>, vector<1x16x256xf32>,
    return
  }
  func.func @transform_0(%arg0: i32) -> (i32, i32, i32) {
    %c0_i32 = arith.constant 0 : i32
    %c0_i32_0 = arith.constant 0 : i32
    %c0_i32_1 = arith.constant 0 : i32
    return %arg0, %c0_i32, %c0_i32_0 : i32, i32, i32
  }
  func.func @transform_1(%arg0: i32) -> (i32, i32) {
    %c0_i32 = arith.constant 0 : i32
    %c0_i32_0 = arith.constant 0 : i32
    %c0_i32_1 = arith.constant 0 : i32
    return %c0_i32, %c0_i32_0 : i32, i32
  }
  func.func @transform_2(%arg0: i32) -> (i32, i32) {
    %c0_i32 = arith.constant 0 : i32
    %c0_i32_0 = arith.constant 0 : i32
    %c0_i32_1 = arith.constant 0 : i32
    return %c0_i32, %c0_i32_0 : i32, i32
  }
  func.func @transform_3(%arg0: i32) -> (i32, i32) {
    %c0_i32 = arith.constant 0 : i32
    %c0_i32_0 = arith.constant 0 : i32
    %c0_i32_1 = arith.constant 0 : i32
    return %c0_i32, %c0_i32_0 : i32, i32
  }
  func.func @transform_4(%arg0: i32) -> (i32, i32) {
    %c0_i32 = arith.constant 0 : i32
    %c0_i32_0 = arith.constant 0 : i32
    %c0_i32_1 = arith.constant 0 : i32
    return %c0_i32, %c0_i32_0 : i32, i32
  }
  func.func @transform_5(%arg0: i32) -> (i32, i32) {
    %c0_i32 = arith.constant 0 : i32
    %c0_i32_0 = arith.constant 0 : i32
    %c0_i32_1 = arith.constant 0 : i32
    return %c0_i32, %c0_i32_0 : i32, i32
  }
  func.func @transform_6(%arg0: i32) -> (i32, i32) {
    %c0_i32 = arith.constant 0 : i32
    %c0_i32_0 = arith.constant 0 : i32
    %c0_i32_1 = arith.constant 0 : i32
    return %c0_i32, %c0_i32_0 : i32, i32
  }
  func.func @transform_7(%arg0: i32) -> (i32, i32, i32) {
    %c0_i32 = arith.constant 0 : i32
    %c0_i32_0 = arith.constant 0 : i32
    %c0_i32_1 = arith.constant 0 : i32
    return %arg0, %c0_i32, %c0_i32_0 : i32, i32, i32
  }
}

</mosaic_0001>

<bundles_post_ra>
// kernel: tpu_custom_call.1
= control target key start
LH: loop header
LB: loop body
LE: loop exit
PB: predicated region body
PF: predicated region fallthrough
CT: control target
= control target key end

     0   :  { %12 = vsyncpa [#allocation3], 0  ;;  %s1743_s0 = inlined_call_operand.hbm [shape: f32[4,96,256], index: 0, kind: input, shape index: {}]   ;;  %s1744_s1 = inlined_call_operand.vmem [shape: f32[12,96], index: 1, kind: input, shape index: {}]   ;;  %s1745_s2 = inlined_call_operand.vmem [shape: f32[12,1], index: 2, kind: input, shape index: {}]   ;;  %s1746_s3 = inlined_call_operand.vmem [shape: f32[96,12], index: 3, kind: input, shape index: {}]   ;;  %s1747_s4 = inlined_call_operand.vmem [shape: f32[96,1], index: 4, kind: input, shape index: {}]   ;;  %s1748_s5 = inlined_call_operand.vmem [shape: f32[16,96], index: 5, kind: input, shape index: {}]   ;;  %s1749_s6 = inlined_call_operand.vmem [shape: f32[16,1], index: 6, kind: input, shape index: {}]   ;;  %s1750_s7 = inlined_call_operand.hbm [shape: f32[4,16,256], index: 7, kind: output, shape index: {}]  }
   0x1   :  { %14 = vsyncpa [#allocation3 + $0x1], 0 }
   0x2   :  { %15 = vsyncpa [#allocation4], 0 }
   0x3   :  { %17 = vsyncpa [#allocation4 + $0x1], 0  ;;  %s1360_s24 = smov 0   ;;  %s1362_s25 = smov 0  }
   0x4   :  { %s1364_s26 = smov 0   ;;  %s1366_s27 = smov 0  }
   0x5 LB: > { %s1381_s28 = sadd.s32 4294967295, %s1310_s27   ;;  %s995_s29 = sadd.s32 4294967294, %s1310_s27   ;;  %s1310_s27 = sphi %s1366_s27, %s1763_s27   ;;  %s1306_s26 = sphi %s1364_s26, %s1762_s26   ;;  %s1302_s25 = sphi %s1362_s25, %s1761_s25   ;;  %s1298_s24 = sphi %s1360_s24, %s1760_s24  }
   0x6   : > { %s1385_s30 = sadd.s32 1, %s1310_s27   ;;  %s30_s8 = sadd.s32 1, %s1306_s26 }
   0x7   : > { %s27_s9 = ssub.s32 %s1310_s27, %s1385_s30  ;;  %p37_p0 = scmp.ne.s32.totalorder %s1306_s26, %s1302_s25 }
   0x8   : > { %p28_p1 = scmp.eq.s32.totalorder %s27_s9, 0  ;;  %p38_p2 = scmp.eq.s32.totalorder %s1310_s27, 0 }
   0x9   : > { %p43_p3 = scmp.ne.s32.totalorder %s1302_s25, %s1298_s24  ;;  %p44_p4 = scmp.eq.s32.totalorder %s1381_s28, 0 }
   0xa   : > { %s1397_s10 = scalar_select %p28_p1, %s1306_s26, %s30_s8  }
   0xb   : > { %p39_p5 = por %p38_p2, %p37_p0  ;;  %p1399_p6 = por %p44_p4, %p43_p3 }
   0xc   : > { %p193_p7 = scmp.eq.s32.totalorder %s1381_s28, 3  ;;  %p199_p8 = scmp.eq.s32.totalorder %s995_s29, 3 }
   0xd   : > { %s1753_s11 = scalar_select %p1399_p6, 1, 0 }
   0xe   : > { %p1128_p9 = scmp.lt.s32.totalorder %s1310_s27, 4  ;;  %p1405_p10 = por %p193_p7, %p37_p0 }
   0xf   : > { %p1409_p11 = por %p199_p8, %p43_p3  ;;  %s237_s14 = sand.u32 1, %s1306_s26  }
  0x10   : > { %s1754_s12 = scalar_select %p1405_p10, 1, 0 }
  0x11   : > { %s1755_s13 = scalar_select %p1409_p11, 1, 0 }
  0x12   : > { %s1114_s15 = smul.u32 3072, %s1310_s27  ;;  %p1420_p12 = pnand %p1128_p9, %p39_p5 }
  0x13   : > { %s1113_s16 = smul.u32 192, %s237_s14  ;;  %s1426_s23 = scalar_lea.sflag [#allocation3], %s237_s14 }
  0x14   : > { %s1418_s19 = scalar_lea.hbm %s1743_s0, %s1114_s15  ;;  %p1220_p0 = pneg %p1420_p12 }
  0x15   : > { %s241_s21 = scalar_lea.vmem [#allocation2], %s1113_s16  ;;  %s1218_s29 = scalar_lea.hbm %s1418_s19, 3072 }
  0x16   : > { %s248_s22 = sshll.u32 %s241_s21, 4  ;;  %p1219_p13 = scmp.ne.s32.totalorder %s1418_s19, %s1218_s29  ;;  %s1424_s22 = int_to_ptr.vmem [resolvable:$true] %s248_s22 }
  0x17   : > { %s1223_s15 = scalar_lea.hbm %s1743_s0, 12288  ;;  %p1224_p3 = scmp.lt.s32.totalorder %s1418_s19, %s1743_s0 }
  0x18   : > { %p1221_p1 = pnand %p1220_p0, %p1219_p13  ;;  %p1225_p4 = scmp.lt.s32.totalorder %s1223_s15, %s1218_s29 }
  0x1a   : > { %p1222_p2 = pneg %p1221_p1  ;;  %p1226_p5 = por %p1225_p4, %p1224_p3 }
  0x1c   : > { %p1227_p7 = pnand %p1226_p5, %p1222_p2 }
  0x1e   : > { %1230 = shalt.err (!%p1227_p7)
}
  0x1f   : > { %s1231_s14 = scalar_lea.vmem %s1424_s22, 3072  ;;  %s1312_s16 = smov [#allocation2]  }
  0x20   : > { %p1232_p8 = scmp.ne.s32.totalorder %s1424_s22, %s1231_s14  ;;  %s1236_s21 = sshll.u32 %s1312_s16, 4  ;;  %s1237_s21 = int_to_ptr.vmem [resolvable:$false] %s1236_s21 }
  0x21   : > { %s1238_s8 = scalar_lea.vmem %s1237_s21, 6144  ;;  %p1239_p1 = scmp.lt.s32.totalorder %s1424_s22, %s1237_s21 }
  0x22   : > { %p1234_p9 = pnand %p1232_p8, %p1220_p0  ;;  %p1240_p11 = scmp.lt.s32.totalorder %s1238_s8, %s1231_s14 }
  0x24   : > { %p1235_p13 = pneg %p1234_p9  ;;  %p1241_p10 = por %p1240_p11, %p1239_p1 }
  0x26   : > { %p1242_p6 = pnand %p1241_p10, %p1235_p13 }
  0x28   : > { %1245 = shalt.err (!%p1242_p6)
}
  0x29   : > { %s1313_s29 = smov 256   ;;  %s1314_s9 = smov 16  }
  0x2a   : > { %1123 = dma.hbm_to_vmem [thread:$0]  (!%p1420_p12), %s1418_s19, 3072, %s1424_s22, %s1426_s23, %s1313_s29, %s1313_s29, %s1314_s9  }
  0x2b   : > { %p999_p0 = scmp.ge.s32.totalorder %s1310_s27, 1  ;;  %p256_p2 = scmp.lt.s32.totalorder %s1310_s27, 5 }
  0x2d   : > { %p257_p3 = pnand %p999_p0, %p256_p2 }
  0x2e   : > { %s1450_s15 = sand.u32 (!%p257_p3), 1, %s1302_s25   ;;  %p1757_p6 = scmp.ne.s32.totalorder (!%p257_p3), %s1753_s11, 0 }
  0x2f   : > { %260 = sbr.rel (%p257_p3) target bundleno = 1045 (0x415), region = 48  ;;  %s263_s18 = scalar_lea.sflag (!%p257_p3), [#allocation3], %s1450_s15 }
  0x30   : > { %s1115_s17 = smul.u32 (!%p257_p3), 192, %s1450_s15 }
  0x32   : > { %s1454_s14 = scalar_lea.vmem (!%p257_p3), [#allocation2], %s1115_s17 }
  0x34   : > { %1289 = dma.done.wait (%p1757_p6), %s263_s18, 3072  }
  0x35   : > { %1291 = vsyncadd (%p1757_p6), %s263_s18, 4294964224  ;;  %v1461_v0 = vld [vmem:[%s1454_s14 + $0xb0] sm:$0xff]  ;;  %v1464_v1 = vld [vmem:[%s1454_s14 + $0xb8] sm:$0xff]  ;;  %vm373_vm0 = vcmask 785408   ;;  %vm481_vm1 = vcmask 97280   ;;  %vm518_vm2 = vcmask 1043456  }
  0x36   : > { %v1467_v2 = vld [vmem:[%s1454_s14 + $0xa0] sm:$0xff]  ;;  %v354_v3 = vadd.f32 %v1464_v1, %v1461_v0  ;;  %v1472_v4 = vld [vmem:[%s1454_s14 + $0xa8] sm:$0xff]  ;;  %v1475_v5 = vld [vmem:[%s1454_s14 + $0x90] sm:$0xff]  ;;  %s1035_s20 = sshll.u32 %s1381_s28, 9  ;;  %s909_s21 = scalar_lea.sflag [#allocation4], %s1450_s15 }
  0x37   : > { %v1478_v6 = vld [vmem:[%s1454_s14 + $0x98] sm:$0xff]  ;;  %v1483_v8 = vld [vmem:[%s1454_s14 + $0x80] sm:$0xff]  ;;  %v1486_v9 = vld [vmem:[%s1454_s14 + $0x88] sm:$0xff]  ;;  %v351_v10 = vadd.f32 %v1472_v4, %v1467_v2  ;;  %s1701_s16 = scalar_lea.hbm %s1750_s7, %s1035_s20  ;;  %p1758_p11 = scmp.ne.s32.totalorder %s1754_s12, 0 }
  0x38   : > { %v348_v7 = vadd.f32 %v1478_v6, %v1475_v5  ;;  %355 = vadd.xlane.f32.xlu0 %v354_v3  ;;  %v345_v11 = vadd.f32 %v1486_v9, %v1483_v8  ;;  %v1493_v12 = vld [vmem:[%s1454_s14 + $0x70] sm:$0xff]  ;;  %v1496_v13 = vld [vmem:[%s1454_s14 + $0x78] sm:$0xff]  ;;  %v1499_v14 = vld [vmem:[%s1454_s14 + $0x60] sm:$0xff]  ;;  %s1317_s28 = smov [#allocation5]  }
  0x39   : > { %v1502_v15 = vld [vmem:[%s1454_s14 + $0x68] sm:$0xff]  ;;  %v342_v16 = vadd.f32 %v1496_v13, %v1493_v12  ;;  %v1509_v18 = vld [vmem:[%s1454_s14 + $0x50] sm:$0xff]  ;;  %v1512_v19 = vld [vmem:[%s1454_s14 + $0x58] sm:$0xff]  ;;  %s1250_s29 = sshll.u32 %s1317_s28, 4  ;;  %s1251_s29 = int_to_ptr.vmem [resolvable:$false] %s1250_s29 }
  0x3a   : > { %349 = vadd.xlane.f32.xlu1 %v348_v7  ;;  %v339_v17 = vadd.f32 %v1502_v15, %v1499_v14  ;;  %v1515_v20 = vld [vmem:[%s1454_s14 + $0x40] sm:$0xff]  ;;  %v1518_v21 = vld [vmem:[%s1454_s14 + $0x48] sm:$0xff]  ;;  %v336_v22 = vadd.f32 %v1512_v19, %v1509_v18  ;;  %v1525_v24 = vld [vmem:[%s1454_s14 + $0x30] sm:$0xff]  ;;  %s1252_s9 = scalar_lea.vmem %s1251_s29, 1024 }
  0x3b   : > { %v333_v23 = vadd.f32 %v1518_v21, %v1515_v20  ;;  %v1528_v25 = vld [vmem:[%s1454_s14 + $0x38] sm:$0xff]  ;;  %v1531_v26 = vld [vmem:[%s1454_s14 + $0x20] sm:$0xff]  ;;  %v1534_v27 = vld [vmem:[%s1454_s14 + $0x28] sm:$0xff] }
  0x3c   : > { %352 = vadd.xlane.f32.xlu0 %v351_v10  ;;  %v330_v28 = vadd.f32 %v1528_v25, %v1525_v24  ;;  %v327_v29 = vadd.f32 %v1534_v27, %v1531_v26  ;;  %v1541_v30 = vld [vmem:[%s1454_s14 + $0x10] sm:$0xff]  ;;  %v1544_v31 = vld [vmem:[%s1454_s14 + $0x18] sm:$0xff]  ;;  %v1547_v32 = vld [vmem:[%s1454_s14] sm:$0xff] }
  0x3d   : > { %v1550_v33 = vld [vmem:[%s1454_s14 + $0x8] sm:$0xff]  ;;  %v324_v34 = vadd.f32 %v1544_v31, %v1541_v30  ;;  %v369_v36 = vld [vmem:[%s1744_s1] sm:$0xff]  ;;  %s1000_s14 = sshll.u32 %s1450_s15, 5 }
  0x3e   : > { %346 = vadd.xlane.f32.xlu1 %v345_v11  ;;  %v321_v35 = vadd.f32 %v1550_v33, %v1547_v32  ;;  %1088 = vmatprep.mubr.msk.f32.mxu0 %vm373_vm0, %v369_v36  ;;  %v370_v61 = vld [vmem:[%s1744_s1 + $0x8] sm:$0xf]  ;;  %v457_v62 = vld [vmem:[%s1746_s3] sm:$0xff]  ;;  %v463_v36 = vld [vmem:[%s1746_s3 + $0x30] sm:$0xff]  ;;  %s296_s11 = scalar_lea.vmem [#allocation5], %s1000_s14 }
  0x3f   : > { %1095 = vmatprep.mubr.msk.f32.mxu1 %vm481_vm1, %v457_v62  ;;  %v372_v63 = vld [vmem:[%s1745_s2 + $0x8] sm:$0xf]  ;;  %v371_v7 = vld [vmem:[%s1745_s2] sm:$0xff]  ;;  %s922_s19 = sshll.u32 %s296_s11, 4  ;;  %s1696_s19 = int_to_ptr.vmem [resolvable:$true] %s922_s19 }
  0x40   : > { %343 = vadd.xlane.f32.xlu0 %v342_v16  ;;  %s1246_s8 = scalar_lea.vmem %s1696_s19, 512  ;;  %p1253_p5 = scmp.lt.s32.totalorder %s1696_s19, %s1251_s29 }
  0x41   : > { %p1247_p10 = scmp.ne.s32.totalorder %s1696_s19, %s1246_s8  ;;  %p1254_p7 = scmp.lt.s32.totalorder %s1252_s9, %s1246_s8 }
  0x42   : > { %340 = vadd.xlane.f32.xlu1 %v339_v17 }
  0x43   : > { %p1248_p12 = pnand %p1247_p10, %p1758_p11  ;;  %p1255_p8 = por %p1254_p7, %p1253_p5 }
  0x44   : > { %337 = vadd.xlane.f32.xlu0 %v336_v22 }
  0x45   : > { %p1249_p4 = pneg %p1248_p12 }
  0x46   : > { %334 = vadd.xlane.f32.xlu1 %v333_v23  ;;  %v458_v23 = vld [vmem:[%s1746_s3 + $0x8] sm:$0xff] }
  0x47   : > { %p1256_p9 = pnand %p1255_p8, %p1249_p4 }
  0x48   : > { %331 = vadd.xlane.f32.xlu0 %v330_v28  ;;  %v459_v28 = vld [vmem:[%s1746_s3 + $0x10] sm:$0xff] }
  0x4a   : > { %328 = vadd.xlane.f32.xlu1 %v327_v29  ;;  %v460_v29 = vld [vmem:[%s1746_s3 + $0x18] sm:$0xff] }
  0x4c   : > { %325 = vadd.xlane.f32.xlu0 %v324_v34  ;;  %v461_v34 = vld [vmem:[%s1746_s3 + $0x20] sm:$0xff] }
  0x4e   : > { %322 = vadd.xlane.f32.xlu1 %v321_v35  ;;  %v462_v35 = vld [vmem:[%s1746_s3 + $0x28] sm:$0xff] }
  0xc1   : > { %v356_v37 = vpop.xlane.xlu0 %355 }
  0xc2   : > { %v368_v38 = vmul.f32 0.00390625, %v356_v37  ;;  %v464_v37 = vld [vmem:[%s1746_s3 + $0x38] sm:$0xff] }
  0xc3   : > { %v350_v39 = vpop.xlane.xlu1 %349 }
  0xc4   : > { %1064 = vmatprep.subr.mxu0 %v368_v38  ;;  %v366_v43 = vmul.f32 0.00390625, %v350_v39  ;;  %v466_v39 = vld [vmem:[%s1746_s3 + $0x48] sm:$0xff] }
  0xc5   : > { %1065 = vmatpush3.msra.mxu0 %v368_v38  ;;  %v353_v40 = vpop.xlane.xlu0 %352  ;;  %v465_v38 = vld [vmem:[%s1746_s3 + $0x40] sm:$0xff] }
  0xc6   : > { %v367_v41 = vmul.f32 0.00390625, %v353_v40  ;;  %v467_v40 = vld [vmem:[%s1746_s3 + $0x50] sm:$0xff] }
  0xc7   : > { %v347_v42 = vpop.xlane.xlu1 %346 }
  0xc8   : > { %1066 = vmatprep.subr.mxu0 %v367_v41  ;;  %v365_v44 = vmul.f32 0.00390625, %v347_v42  ;;  %v1315_v42 = vmov 0  }
  0xc9   : > { %1067 = vmatpush3.msra.mxu0 %v367_v41  ;;  %v344_v45 = vpop.xlane.xlu0 %343  ;;  %v468_v41 = vld [vmem:[%s1746_s3 + $0x58] sm:$0xff]  ;;  %1169 = vset.pattern.permute.xlu1 %v1315_v42 }
  0xca   : > { %1068 = vmatprep.subr.mxu0 %v366_v43  ;;  %v364_v46 = vmul.f32 0.00390625, %v344_v45  ;;  %1168 = vset.pattern.permute.xlu0 %v1315_v42 }
  0xcb   : > { %v341_v47 = vpop.xlane.xlu1 %340  ;;  %1069 = vmatpush3.msra.mxu0 %v366_v43 }
  0xcc   : > { %1070 = vmatprep.subr.mxu0 %v365_v44  ;;  %v363_v48 = vmul.f32 0.00390625, %v341_v47 }
  0xcd   : > { %1071 = vmatpush3.msra.mxu0 %v365_v44  ;;  %v338_v49 = vpop.xlane.xlu0 %337 }
  0xce   : > { %1072 = vmatprep.subr.mxu0 %v364_v46  ;;  %v362_v50 = vmul.f32 0.00390625, %v338_v49  ;;  %v471_v49 = vld [vmem:[%s1747_s4 + $0x10] sm:$0xff] }
  0xcf   : > { %v335_v51 = vpop.xlane.xlu1 %334  ;;  %1073 = vmatpush3.msra.mxu0 %v364_v46 }
  0xd0   : > { %1074 = vmatprep.subr.mxu0 %v363_v48  ;;  %v361_v52 = vmul.f32 0.00390625, %v335_v51  ;;  %v476_v51 = vld [vmem:[%s1747_s4 + $0x38] sm:$0xff] }
  0xd1   : > { %1075 = vmatpush3.msra.mxu0 %v363_v48  ;;  %v332_v53 = vpop.xlane.xlu0 %331 }
  0xd2   : > { %1076 = vmatprep.subr.mxu0 %v362_v50  ;;  %v360_v54 = vmul.f32 0.00390625, %v332_v53  ;;  %v478_v53 = vld [vmem:[%s1747_s4 + $0x48] sm:$0xff] }
  0xd3   : > { %v329_v55 = vpop.xlane.xlu1 %328  ;;  %1077 = vmatpush3.msra.mxu0 %v362_v50 }
  0xd4   : > { %1078 = vmatprep.subr.mxu0 %v361_v52  ;;  %v359_v56 = vmul.f32 0.00390625, %v329_v55 }
  0xd5   : > { %1079 = vmatpush3.msra.mxu0 %v361_v52  ;;  %v326_v57 = vpop.xlane.xlu0 %325 }
  0xd6   : > { %1080 = vmatprep.subr.mxu0 %v360_v54  ;;  %v358_v58 = vmul.f32 0.00390625, %v326_v57 }
  0xd7   : > { %v323_v59 = vpop.xlane.xlu1 %322  ;;  %1081 = vmatpush3.msra.mxu0 %v360_v54 }
  0xd8   : > { %1082 = vmatprep.subr.mxu0 %v359_v56  ;;  %v357_v60 = vmul.f32 0.00390625, %v323_v59  ;;  %v469_v59 = vld [vmem:[%s1747_s4] sm:$0xff] }
  0xd9   : > { %1083 = vmatpush3.msra.mxu0 %v359_v56  ;;  %v477_v56 = vld [vmem:[%s1747_s4 + $0x40] sm:$0xff] }
  0xda   : > { %1084 = vmatprep.subr.mxu0 %v358_v58 }
  0xdb   : > { %1085 = vmatpush3.msra.mxu0 %v358_v58 }
  0xdc   : > { %1086 = vmatprep.subr.mxu0 %v357_v60 }
  0xdd   : > { %1087 = vmatpush3.msra.mxu0 %v357_v60 }
  0xde   : > { %1089 = vmatmul.mubr.msk.f32.vlgmr.msra.gmra.mxu0 %vm373_vm0, %v370_v61  ;;  %v480_v61 = vld [vmem:[%s1747_s4 + $0x58] sm:$0xff] }
 0x19e   : > { %v1090_v3 = vpop.f32.mrf.mxu0 }
 0x19f   : > { %v452_v10 = vadd.f32 %v1090_v3, %v372_v63 }
 0x1a0   : > { %v446_v11 = vpop.f32.mrf.mxu0 }
 0x1a1   : > { %v456_v16 = vmax.f32 %v452_v10, 0.0  ;;  %v447_v17 = vadd.f32 %v446_v11, %v371_v7  ;;  %v479_v10 = vld [vmem:[%s1747_s4 + $0x50] sm:$0xff] }
 0x1a3   : > { %v455_v22 = vmax.f32 %v447_v17, 0.0  ;;  %1091 = vmatprep.subr.msk.mxu1 %vm518_vm2, %v456_v16 }
 0x1a4   : > { %1092 = vmatpush3.msk.msra.mxu1 %vm518_vm2, %v456_v16 }
 0x1a5   : > { %1093 = vmatprep.subr.mxu1 %v455_v22 }
 0x1a6   : > { %1094 = vmatpush3.msra.mxu1 %v455_v22 }
 0x1a7   : > { %1096 = vmatmul.mubr.msk.f32.vlgmr.msra.gmra.mxu1 %vm481_vm1, %v458_v23 }
 0x1a8   : > { %1098 = vmatprep.mubr.msk.f32.mxu1 %vm481_vm1, %v459_v28  ;;  %v475_v28 = vld [vmem:[%s1747_s4 + $0x30] sm:$0xff] }
 0x1ab   : > { %1099 = vmatmul.mubr.msk.f32.gmra.mxu1 %vm481_vm1, %v460_v29 }
 0x1ac   : > { %1101 = vmatprep.mubr.msk.f32.mxu1 %vm481_vm1, %v461_v34 }
 0x1af   : > { %1102 = vmatmul.mubr.msk.f32.gmra.mxu1 %vm481_vm1, %v462_v35 }
 0x1b0   : > { %1104 = vmatprep.mubr.msk.f32.mxu1 %vm481_vm1, %v463_v36  ;;  %v474_v36 = vld [vmem:[%s1747_s4 + $0x28] sm:$0xff] }
 0x1b3   : > { %1105 = vmatmul.mubr.msk.f32.gmra.mxu1 %vm481_vm1, %v464_v37 }
 0x1b4   : > { %1107 = vmatprep.mubr.msk.f32.mxu1 %vm481_vm1, %v465_v38 }
 0x1b7   : > { %1108 = vmatmul.mubr.msk.f32.gmra.mxu1 %vm481_vm1, %v466_v39 }
 0x1b8   : > { %1110 = vmatprep.mubr.msk.f32.mxu1 %vm481_vm1, %v467_v40  ;;  %v473_v40 = vld [vmem:[%s1747_s4 + $0x20] sm:$0xff] }
 0x1bb   : > { %1111 = vmatmul.mubr.msk.f32.gmra.mxu1 %vm481_vm1, %v468_v41 }
 0x267   : > { %v1097_v43 = vpop.f32.mrf.mxu1 }
 0x269   : > { %v588_v44 = vpop.f32.mrf.mxu1 }
 0x26a   : > { %v589_v11 = vadd.f32 %v588_v44, %v469_v59  ;;  %v472_v44 = vld [vmem:[%s1747_s4 + $0x18] sm:$0xff] }
 0x26b   : > { %v1100_v45 = vpop.f32.mrf.mxu1 }
 0x26c   : > { %v1016_v35 = vmul.f32 -1.442695, %v589_v11 }
 0x26d   : > { %v598_v46 = vpop.f32.mrf.mxu1 }
 0x26e   : > { %v599_v54 = vadd.f32 %v598_v46, %v471_v49 }
 0x26f   : > { %v1103_v47 = vpop.f32.mrf.mxu1 }
 0x270   : > { %v1018_v62 = vmul.f32 -1.442695, %v599_v54  ;;  %v614_v39 = vadd.f32 %v1103_v47, %v474_v36  ;;  %v470_v47 = vld [vmem:[%s1747_s4 + $0x8] sm:$0xff] }
 0x271   : > { %v608_v48 = vpop.f32.mrf.mxu1 }
 0x272   : > { %v609_v42 = vadd.f32 %v608_v48, %v473_v40  ;;  %v1021_v46 = vmul.f32 -1.442695, %v614_v39 }
 0x273   : > { %v1106_v50 = vpop.f32.mrf.mxu1 }
 0x274   : > { %v624_v57 = vadd.f32 %v1106_v50, %v476_v51  ;;  %v604_v51 = vadd.f32 %v1100_v45, %v472_v44 }
 0x275   : > { %v618_v52 = vpop.f32.mrf.mxu1 }
 0x276   : > { %v1023_v16 = vmul.f32 -1.442695, %v624_v57  ;;  %v619_v37 = vadd.f32 %v618_v52, %v475_v28  ;;  %v1020_v52 = vmul.f32 -1.442695, %v609_v42  ;;  %v594_v57 = vadd.f32 %v1097_v43, %v470_v47 }
 0x277   : > { %v1109_v55 = vpop.f32.mrf.mxu1 }
 0x278   : > { %v634_v58 = vadd.f32 %v1109_v55, %v478_v53  ;;  %v1022_v41 = vmul.f32 -1.442695, %v619_v37 }
 0x279   : > { %v628_v60 = vpop.f32.mrf.mxu1 }
 0x27a   : > { %v1025_v63 = vmul.f32 -1.442695, %v634_v58  ;;  %v629_v3 = vadd.f32 %v628_v60, %v477_v56  ;;  %v1019_v58 = vmul.f32 -1.442695, %v604_v51 }
 0x27b   : > { %v1112_v7 = vpop.f32.mrf.mxu1 }
 0x27c   : > { %v1024_v17 = vmul.f32 -1.442695, %v629_v3  ;;  %v644_v22 = vadd.f32 %v1112_v7, %v480_v61  ;;  %1170 = vpow2.f32 %v1025_v63  ;;  %v1017_v63 = vmul.f32 -1.442695, %v594_v57 }
 0x27d   : > { %v638_v23 = vpop.f32.mrf.mxu1  ;;  %1172 = vpow2.f32 %v1018_v62 }
 0x27e   : > { %v1027_v29 = vmul.f32 -1.442695, %v644_v22  ;;  %v639_v34 = vadd.f32 %v638_v23, %v479_v10  ;;  %1174 = vpow2.f32 %v1024_v17 }
 0x27f   : > { %1176 = vpow2.f32 %v1023_v16 }
 0x280   : > { %1178 = vpow2.f32 %v1027_v29  ;;  %v1026_v38 = vmul.f32 -1.442695, %v639_v34 }
 0x281   : > { %1180 = vpow2.f32 %v1016_v35 }
 0x282   : > { %1182 = vpow2.f32 %v1026_v38 }
 0x283   : > { %1184 = vpow2.f32 %v1022_v41  ;;  %v806_v41 = vld [vmem:[%s1749_s6 + $0x8] sm:$0xff] }
 0x284   : > { %1186 = vpow2.f32 %v1021_v46 }
 0x289   : > { %v1171_v49 = vpop.eup %1170 }
 0x28a   : > { %v1173_v50 = vpop.eup %1172  ;;  %v692_v53 = vadd.f32 1.0, %v1171_v49 }
 0x28b   : > { %v1175_v54 = vpop.eup %1174  ;;  %v685_v60 = vadd.f32 1.0, %v1173_v50 }
 0x28c   : > { %v1177_v55 = vpop.eup %1176  ;;  %1188 = vrcp.f32 %v692_v53  ;;  %v691_v48 = vadd.f32 1.0, %v1175_v54  ;;  %v1316_v53 = vmov 0.0  }
 0x28d   : > { %v1179_v56 = vpop.eup %1178  ;;  %1190 = vpow2.f32 %v1020_v52  ;;  %v690_v45 = vadd.f32 1.0, %v1177_v55  ;;  %v805_v52 = vld [vmem:[%s1749_s6] sm:$0xff]  ;;  %887 = vmatprep.mubr.f32.mxu1 %v1316_v53 }
 0x28e   : > { %v694_v59 = vadd.f32 1.0, %v1179_v56  ;;  %1192 = vrcp.f32 %v691_v48  ;;  %v1181_v61 = vpop.eup %1180 }
 0x28f   : > { %v1183_v62 = vpop.eup %1182  ;;  %v683_v3 = vadd.f32 1.0, %v1181_v61 }
 0x290   : > { %1194 = vrcp.f32 %v694_v59  ;;  %v693_v7 = vadd.f32 1.0, %v1183_v62  ;;  %v1185_v10 = vpop.eup %1184 }
 0x291   : > { %1196 = vpow2.f32 %v1019_v58  ;;  %v1187_v11 = vpop.eup %1186  ;;  %v689_v43 = vadd.f32 1.0, %v1185_v10 }
 0x292   : > { %1198 = vrcp.f32 %v685_v60  ;;  %v688_v23 = vadd.f32 1.0, %v1187_v11 }
 0x293   : > { %1200 = vrcp.f32 %v690_v45 }
 0x294   : > { %1202 = vpow2.f32 %v1017_v63 }
 0x295   : > { %1204 = vrcp.f32 %v683_v3 }
 0x296   : > { %1206 = vrcp.f32 %v693_v7 }
 0x297   : > { %1208 = vrcp.f32 %v689_v43 }
 0x298   : > { %1210 = vrcp.f32 %v688_v23 }
 0x299   : > { %v1189_v16 = vpop.eup %1188 }
 0x29a   : > { %766 = vperm.xlu1 %1169, %v1189_v16   ;;  %v1191_v17 = vpop.eup %1190 }
 0x29b   : > { %v1193_v22 = vpop.eup %1192  ;;  %v687_v35 = vadd.f32 1.0, %v1191_v17 }
 0x29d   : > { %v1195_v28 = vpop.eup %1194  ;;  %1212 = vrcp.f32 %v687_v35 }
 0x29e   : > { %776 = vperm.xlu0 %1168, %v1195_v28   ;;  %761 = vperm.xlu1 %1169, %v1193_v22   ;;  %v1197_v29 = vpop.eup %1196 }
 0x29f   : > { %v1199_v34 = vpop.eup %1198  ;;  %v686_v39 = vadd.f32 1.0, %v1197_v29 }
 0x2a0   : > { %v1201_v36 = vpop.eup %1200 }
 0x2a1   : > { %v1203_v37 = vpop.eup %1202  ;;  %1214 = vrcp.f32 %v686_v39 }
 0x2a2   : > { %756 = vperm.xlu1 %1169, %v1201_v36   ;;  %731 = vperm.xlu0 %1168, %v1199_v34   ;;  %v1205_v38 = vpop.eup %1204  ;;  %v684_v42 = vadd.f32 1.0, %v1203_v37 }
 0x2a3   : > { %v1207_v40 = vpop.eup %1206 }
 0x2a4   : > { %v1209_v44 = vpop.eup %1208  ;;  %1216 = vrcp.f32 %v684_v42 }
 0x2a5   : > { %v1211_v46 = vpop.eup %1210 }
 0x2a6   : > { %771 = vperm.xlu1 %1169, %v1207_v40   ;;  %721 = vperm.xlu0 %1168, %v1205_v38  }
 0x2aa   : > { %751 = vperm.xlu1 %1169, %v1209_v44   ;;  %814 = vperm.xlu0 %1168, %v806_v41   ;;  %v1213_v49 = vpop.eup %1212 }
 0x2ae   : > { %746 = vperm.xlu1 %1169, %v1211_v46   ;;  %v1215_v50 = vpop.eup %1214 }
 0x2b1   : > { %v1217_v51 = vpop.eup %1216 }
 0x2b2   : > { %741 = vperm.xlu1 %1169, %v1213_v49  }
 0x2b6   : > { %736 = vperm.xlu1 %1169, %v1215_v50  }
 0x2ba   : > { %726 = vperm.xlu1 %1169, %v1217_v51  }
 0x2be   : > { %809 = vperm.xlu1 %1169, %v805_v52  }
 0x315   : > { %v767_v54 = vpop.permute.xlu1 %766 }
 0x316   : > { %v798_v61 = vmul.f32 %v767_v54, %v1478_v6  ;;  %v797_v45 = vmul.f32 %v767_v54, %v1475_v5 }
 0x319   : > { %v777_v47 = vpop.permute.xlu0 %776  ;;  %v762_v55 = vpop.permute.xlu1 %761 }
 0x31a   : > { %v801_v48 = vmul.f32 %v777_v47, %v1461_v0  ;;  %v802_v56 = vmul.f32 %v777_v47, %v1464_v1  ;;  %v796_v63 = vmul.f32 %v762_v55, %v1486_v9  ;;  %v795_v0 = vmul.f32 %v762_v55, %v1483_v8 }
 0x31c   : > { %831 = vmatprep.subr.mxu1 %v802_v56 }
 0x31d   : > { %v757_v57 = vpop.permute.xlu1 %756  ;;  %832 = vmatpush1.msra.mxu1 %v801_v48 }
 0x31e   : > { %v794_v1 = vmul.f32 %v757_v57, %v1496_v13 }
 0x321   : > { %v772_v58 = vpop.permute.xlu1 %771 }
 0x322   : > { %v799_v59 = vmul.f32 %v772_v58, %v1467_v2  ;;  %v800_v60 = vmul.f32 %v772_v58, %v1472_v4  ;;  %v793_v2 = vmul.f32 %v757_v57, %v1493_v12  ;;  %v732_v12 = vpop.permute.xlu0 %731 }
 0x324   : > { %833 = vmatprep.subr.mxu1 %v800_v60 }
 0x325   : > { %834 = vmatpush1.msra.mxu1 %v799_v59  ;;  %v752_v62 = vpop.permute.xlu1 %751 }
 0x326   : > { %835 = vmatprep.subr.mxu1 %v798_v61  ;;  %v792_v6 = vmul.f32 %v752_v62, %v1502_v15  ;;  %v791_v5 = vmul.f32 %v752_v62, %v1499_v14  ;;  %v722_v11 = vpop.permute.xlu0 %721 }
 0x327   : > { %836 = vmatpush1.msra.mxu1 %v797_v45  ;;  %v780_v16 = vmul.f32 %v722_v11, %v1550_v33 }
 0x328   : > { %837 = vmatprep.subr.mxu1 %v796_v63 }
 0x329   : > { %838 = vmatpush1.msra.mxu1 %v795_v0  ;;  %v747_v4 = vpop.permute.xlu1 %746 }
 0x32a   : > { %839 = vmatprep.subr.mxu1 %v794_v1  ;;  %v790_v3 = vmul.f32 %v747_v4, %v1512_v19  ;;  %v789_v9 = vmul.f32 %v747_v4, %v1509_v18  ;;  %v784_v19 = vmul.f32 %v732_v12, %v1534_v27  ;;  %v783_v18 = vmul.f32 %v732_v12, %v1531_v26  ;;  %v804_v26 = vld [vmem:[%s1748_s5 + $0x8] sm:$0xff]  ;;  %v815_v22 = vpop.permute.xlu0 %814 }
 0x32b   : > { %840 = vmatpush1.msra.mxu1 %v793_v2 }
 0x32c   : > { %841 = vmatprep.subr.mxu1 %v792_v6 }
 0x32d   : > { %842 = vmatpush1.msra.mxu1 %v791_v5  ;;  %v742_v8 = vpop.permute.xlu1 %741 }
 0x32e   : > { %v787_v13 = vmul.f32 %v742_v8, %v1515_v20  ;;  %v788_v7 = vmul.f32 %v742_v8, %v1518_v21  ;;  %843 = vmatprep.subr.mxu1 %v790_v3 }
 0x32f   : > { %844 = vmatpush1.msra.mxu1 %v789_v9 }
 0x330   : > { %845 = vmatprep.subr.mxu1 %v788_v7 }
 0x331   : > { %846 = vmatpush1.msra.mxu1 %v787_v13  ;;  %v737_v15 = vpop.permute.xlu1 %736 }
 0x332   : > { %v785_v14 = vmul.f32 %v737_v15, %v1525_v24  ;;  %v786_v10 = vmul.f32 %v737_v15, %v1528_v25  ;;  %v779_v24 = vmul.f32 %v722_v11, %v1547_v32  ;;  %v803_v25 = vld [vmem:[%s1748_s5] sm:$0xff] }
 0x334   : > { %847 = vmatprep.subr.mxu1 %v786_v10 }
 0x335   : > { %848 = vmatpush1.msra.mxu1 %v785_v14  ;;  %v727_v20 = vpop.permute.xlu1 %726 }
 0x336   : > { %v781_v21 = vmul.f32 %v727_v20, %v1541_v30  ;;  %v782_v43 = vmul.f32 %v727_v20, %v1544_v31  ;;  %849 = vmatprep.subr.mxu1 %v784_v19 }
 0x337   : > { %850 = vmatpush1.msra.mxu1 %v783_v18 }
 0x338   : > { %851 = vmatprep.subr.mxu1 %v782_v43 }
 0x339   : > { %852 = vmatpush1.msra.mxu1 %v781_v21  ;;  %v810_v27 = vpop.permute.xlu1 %809 }
 0x33a   : > { %853 = vmatprep.subr.mxu1 %v780_v16 }
 0x33b   : > { %854 = vmatpush1.msra.mxu1 %v779_v24 }
 0x33c   : > { %1028 = vmatmul.mubr.msk.f32.vlgmr.msra.gmra.mxu1 %vm373_vm0, %v803_v25 }
 0x33d   : > { %893 = vmatprep.mubr.f32.mxu1 %v1316_v53 }
 0x340   : > { %1029 = vmatmul.mubr.msk.f32.gmra.mxu1 %vm373_vm0, %v804_v26 }
 0x3fc   : > { %v889_v30 = vpop.f32.mrf.mxu1 }
 0x3fd   : > { %v890_v31 = vadd.f32 %v889_v30, %v810_v27 }
 0x3fe   : > { %v891_v32 = vpop.f32.mrf.mxu1 }
 0x3ff   : > { %v900_v33 = vmax.f32 %v890_v31, 0.0  ;;  %v892_v17 = vadd.f32 %v891_v32, %v810_v27 }
 0x400   : > { %v895_v23 = vpop.f32.mrf.mxu1 }
 0x401   : > { %904 = vst [vmem:[%s296_s11] sm:$0xff] %v900_v33  ;;  %v901_v28 = vmax.f32 %v892_v17, 0.0  ;;  %v896_v29 = vadd.f32 %v895_v23, %v815_v22 }
 0x402   : > { %v897_v34 = vpop.f32.mrf.mxu1 }
 0x403   : > { %905 = vst [vmem:[%s296_s11 + $0x8] sm:$0xff] %v901_v28  ;;  %v902_v35 = vmax.f32 %v896_v29, 0.0  ;;  %v898_v36 = vadd.f32 %v897_v34, %v815_v22 }
 0x405   : > { %906 = vst [vmem:[%s296_s11 + $0x10] sm:$0xff] %v902_v35  ;;  %v903_v37 = vmax.f32 %v898_v36, 0.0 }
 0x407   : > { %907 = vst [vmem:[%s296_s11 + $0x18] sm:$0xff] %v903_v37 }
 0x408   : > { %1259 = shalt.err (!%p1256_p9)
}
 0x409   : > { %s1260_s17 = scalar_lea.hbm %s1701_s16, 512  ;;  %s1264_s11 = scalar_lea.hbm %s1750_s7, 2048 }
 0x40a   : > { %p1261_p13 = scmp.ne.s32.totalorder %s1701_s16, %s1260_s17  ;;  %p1265_p2 = scmp.lt.s32.totalorder %s1701_s16, %s1750_s7 }
 0x40b   : > { %p1266_p3 = scmp.lt.s32.totalorder %s1264_s11, %s1260_s17 }
 0x40c   : > { %p1262_p1 = pnand %p1261_p13, %p1758_p11 }
 0x40d   : > { %p1267_p6 = por %p1266_p3, %p1265_p2 }
 0x40e   : > { %p1263_p0 = pneg %p1262_p1 }
 0x410   : > { %p1268_p10 = pnand %p1267_p6, %p1263_p0 }
 0x412   : > { %1271 = shalt.err (!%p1268_p10)
}
 0x413   : > { %s1318_s23 = smov 256   ;;  %s1319_s8 = smov 16  }
 0x414   : > { %1118 = dma.vmem_to_hbm [thread:$0]  (%p1758_p11), %s1696_s19, 512, %s1701_s16, %s909_s21, %s1318_s23, %s1318_s23, %s1319_s8  }
 0x415 PF: > { %p1129_p12 = scmp.ge.s32.totalorder %s1310_s27, 2  ;;  %s937_s28 = sand.u32 1, %s1298_s24  }
 0x416   : > { %p1759_p4 = scmp.ne.s32.totalorder %s1755_s13, 0  ;;  %s938_s29 = scalar_lea.sflag [#allocation4], %s937_s28 }
 0x418   : > { %p1125_p5 = pnand %p1129_p12, %p1759_p4 }
 0x41a   : > { %p1126_p7 = pneg %p1125_p5 }
 0x41c   : > { %1293 = dma.done.wait (%p1126_p7), %s938_s29, 512  }
 0x41d   : > { %1295 = vsyncadd (%p1126_p7), %s938_s29, 4294966784  ;;  %p20_p8 = scmp.ge.s32.totalorder %s1385_s30, 6   ;;  %s1760_s24 = smov %s1302_s25 }
 0x41e   : > { %s1761_s25 = smov %s1306_s26  ;;  %s1762_s26 = smov %s1397_s10 }
 0x41f   : > { %s1763_s27 = smov %s1385_s30  ;;  %22 = sbr.rel (!%p20_p8) target bundleno = 5 (0x5), region = 93 }
 0x424   :  { %943 = vsyncpa [#allocation3], 1 }
 0x425   :  { %945 = vsyncpa [#allocation3 + $0x1], 1 }
 0x426   :  { %946 = vsyncpa [#allocation4], 1 }
 0x427   :  { %948 = vsyncpa [#allocation4 + $0x1], 1 }

</bundles_post_ra>
